<compile_context>
chip_gen: v6e
topology: v6e:2x2x1
jax: 0.10.0
libtpu: 0.0.40
codegen_flags: <defaults>
</compile_context>

<pallas_src>
import jax
import jax.numpy as jnp
import numpy as np
from jax import lax
from jax.experimental import pallas as pl
from jax.experimental.pallas import tpu as pltpu

H = 50                 # nn.RNN hidden_size
HP = 128               # lane-padded hidden size (TPU lane width)
IN = 1                 # nn.RNN input_size
FULL_UNROLL_MAX_T = 64 # beyond this, use xb-in-VMEM + bounded-unroll fori_loop


def rnn_kernel(x_ref, w_ih_ref, w_hh_t_ref, b_ref, w_out_ref, b_out_ref,
               y_ref, h_last_ref, h_all_ref, xb_ref):
    """Single-invocation kernel: sequential RNN recurrence + hoisted output Linear.

    x_ref      : VMEM (T, 1)      f32  -- input sequence (time-major, batch=1)
    w_ih_ref   : VMEM (1, HP)     f32  -- W_ih (lane-padded, input_size=1)
    w_hh_t_ref : VMEM (HP, HP)    f32  -- W_hh^T (lane-padded)
    b_ref      : VMEM (1, HP)     f32  -- b_ih + b_hh (lane-padded)
    w_out_ref  : VMEM (1, HP)     f32  -- h20 weight as a row (lane-padded)
    b_out_ref  : SMEM (1, 1)      f32  -- h20 bias (true scalar)
    y_ref      : VMEM (T, 1)      f32  -- per-step output
    h_last_ref : VMEM (1, HP)     f32  -- final hidden state (lane-padded)
    h_all_ref  : VMEM (T_pad, HP) f32  -- scratch: all hidden states (for batched h20)
    xb_ref     : VMEM (T_pad, HP) f32  -- scratch: staged x_t*W_ih + b (large-T path only)
    """
    T = y_ref.shape[0]

    w_hh_t = w_hh_t_ref[...]                 # (HP, HP), loaded once, reused every step
    h0 = jnp.zeros((1, HP), jnp.float32)     # hidden=None  =>  h0 = 0

    if T <= FULL_UNROLL_MAX_T:
        # Fully-unrolled serial chain, all indices static; xb lives in vregs (T/8 vregs).
        # Hoisted off the chain: xb[t] = x_t * W_ih + (b_ih + b_hh), one vectorized pass.
        xb = x_ref[...] * w_ih_ref[...] + b_ref[...]          # (T, HP)
        h = h0
        for t in range(T):
            pre = xb[t:t + 1, :] + jnp.dot(h, w_hh_t,
                                           preferred_element_type=jnp.float32)
            h = jnp.tanh(pre)                                  # (1, HP)
            h_all_ref[t:t + 1, :] = h        # static-row store, off the h->h chain
    else:
        # Scaling path: stage xb in VMEM (h-independent loads, prefetchable) and bound
        # the unroll so vreg live ranges / code size stay under control.
        xb_ref[:T, :] = x_ref[...] * w_ih_ref[...] + b_ref[...]

        def step(t, h):
            pre = xb_ref[pl.ds(t, 1), :] + jnp.dot(h, w_hh_t,
                                                   preferred_element_type=jnp.float32)
            h = jnp.tanh(pre)
            h_all_ref[pl.ds(t, 1), :] = h
            return h

        h = lax.fori_loop(0, T, step, h0, unroll=8)

    h_last_ref[...] = h

    # Output Linear hoisted out of the recurrence: one batched lane-reduce + one store
    # instead of T per-step masked (last-dim = 1) stores.
    h_all = h_all_ref[:T, :]                                   # (T, HP)
    y = jnp.sum(h_all * w_out_ref[...], axis=-1, keepdims=True) + b_out_ref[0, 0]
    y_ref[...] = y


def recurrent_net_forward(inputs, params):
    """Mirrors RecurrentNet.forward: returns (output (T, 1), hidden (1, 1, 50))."""
    w_ih, w_hh, b_ih, b_hh, w_out, b_out = params
    x = inputs.reshape(-1, 1).astype(jnp.float32)       # inputs.view(-1, 1, 1), batch = 1
    T = x.shape[0]
    T_pad = max(8, ((T + 7) // 8) * 8)                   # sublane-friendly scratch rows

    # Zero-pad parameters to lane width (padded lanes provably stay zero in the recurrence).
    w_ih_p = jnp.zeros((1, HP), jnp.float32).at[0, :H].set(w_ih[:, 0])
    w_hh_t_p = jnp.zeros((HP, HP), jnp.float32).at[:H, :H].set(w_hh.T)
    b_p = jnp.zeros((1, HP), jnp.float32).at[0, :H].set(b_ih + b_hh)
    w_out_p = jnp.zeros((1, HP), jnp.float32).at[0, :H].set(w_out[0])
    b_out_p = b_out.reshape(1, 1).astype(jnp.float32)

    vmem = pltpu.MemorySpace.VMEM
    smem = pltpu.MemorySpace.SMEM
    y, h_last = pl.pallas_call(
        rnn_kernel,
        out_shape=(jax.ShapeDtypeStruct((T, 1), jnp.float32),
                   jax.ShapeDtypeStruct((1, HP), jnp.float32)),
        in_specs=[pl.BlockSpec(memory_space=vmem),    # x
                  pl.BlockSpec(memory_space=vmem),    # W_ih
                  pl.BlockSpec(memory_space=vmem),    # W_hh^T
                  pl.BlockSpec(memory_space=vmem),    # b_ih + b_hh
                  pl.BlockSpec(memory_space=vmem),    # W_out (row)
                  pl.BlockSpec(memory_space=smem)],   # b_out (scalar)
        out_specs=(pl.BlockSpec(memory_space=vmem),
                   pl.BlockSpec(memory_space=vmem)),
        scratch_shapes=[pltpu.VMEM((T_pad, HP), jnp.float32),   # h_all
                        pltpu.VMEM((T_pad, HP), jnp.float32)],  # xb (large-T path)
    )(x, w_ih_p, w_hh_t_p, b_p, w_out_p, b_out_p)

    hidden = h_last[:, :H].reshape(1, 1, H)   # (num_layers=1, batch=1, hidden=50)
    return y, hidden


def reference_forward(inputs, params):
    """Pure-JAX reference matching torch nn.RNN + Linear semantics."""
    w_ih, w_hh, b_ih, b_hh, w_out, b_out = params
    x = inputs.reshape(-1).astype(jnp.float32)

    def step(h, x_t):
        h_new = jnp.tanh(x_t * w_ih[:, 0] + h @ w_hh.T + b_ih + b_hh)
        return h_new, h_new

    h0 = jnp.zeros((H,), jnp.float32)
    h_last, hs = lax.scan(step, h0, x)               # hs: (T, H)
    y = hs @ w_out[0] + b_out[0]                     # (T,)
    return y[:, None], h_last.reshape(1, 1, H)


if __name__ == "__main__":
    key = jax.random.PRNGKey(0)
    ks = jax.random.split(key, 7)
    T = 8                                            # sequence length implied by view(-1, 1, 1)
    bound = 1.0 / np.sqrt(H)                         # PyTorch default init scale

    w_ih = jax.random.uniform(ks[0], (H, IN), jnp.float32, -bound, bound)
    w_hh = jax.random.uniform(ks[1], (H, H), jnp.float32, -bound, bound)
    b_ih = jax.random.uniform(ks[2], (H,), jnp.float32, -bound, bound)
    b_hh = jax.random.uniform(ks[3], (H,), jnp.float32, -bound, bound)
    w_out = jax.random.uniform(ks[4], (1, H), jnp.float32, -bound, bound)
    b_out = jax.random.uniform(ks[5], (1,), jnp.float32, -bound, bound)
    params = (w_ih, w_hh, b_ih, b_hh, w_out, b_out)

    inputs = jax.random.normal(ks[6], (T,), jnp.float32)

    out, hidden = recurrent_net_forward(inputs, params)
    jax.block_until_ready((out, hidden))

    out_ref, hidden_ref = reference_forward(inputs, params)
    np.testing.assert_allclose(np.asarray(out), np.asarray(out_ref), rtol=1e-5, atol=1e-5)
    np.testing.assert_allclose(np.asarray(hidden), np.asarray(hidden_ref), rtol=1e-5, atol=1e-5)
    assert out.shape == (T, 1) and hidden.shape == (1, 1, H)

    print("KERNEL_OK")
</pallas_src>

<mosaic_0001>
module attributes {stable_mosaic.version = 11 : i64} {
  func.func @rnn_kernel(%arg0: memref<8x1xf32, #tpu.memory_space<vmem>>, %arg1: memref<1x128xf32, #tpu.memory_space<vmem>>, %arg2: memref<128x128xf32, #tpu.memory_space<vmem>>, %arg3: memref<1x128xf32, #tpu.memory_space<vmem>>, %arg4: memref<1x128xf32, #tpu.memory_space<vmem>>, %arg5: memref<1x1xf32, #tpu.memory_space<smem>>, %arg6: memref<8x1xf32, #tpu.memory_space<vmem>>, %arg7: memref<1x128xf32, #tpu.memory_space<vmem>>, %arg8: memref<8x128xf32, #tpu.memory_space<vmem>>, %arg9: memref<8x128xf32, #tpu.memory_space<vmem>>) attributes {dimension_semantics = [], scalar_prefetch = 0 : i64, scratch_operands = 2 : i64, tpu.core_type = #tpu.core_type<tc>} {
    %c0 = arith.constant 0 : index
    %c0_0 = arith.constant 0 : index
    %0 = vector.load %arg2[%c0, %c0_0] : memref<128x128xf32, #tpu.memory_space<vmem>>, vector<128x128xf32>
    %cst = arith.constant 0.000000e+00 : f32
    %1 = vector.broadcast %cst : f32 to vector<1x128xf32>
    %c0_1 = arith.constant 0 : index
    %c0_2 = arith.constant 0 : index
    %2 = vector.load %arg0[%c0_1, %c0_2] : memref<8x1xf32, #tpu.memory_space<vmem>>, vector<8x1xf32>
    %c0_3 = arith.constant 0 : index
    %c0_4 = arith.constant 0 : index
    %3 = vector.load %arg1[%c0_3, %c0_4] : memref<1x128xf32, #tpu.memory_space<vmem>>, vector<1x128xf32>
    %4 = vector.broadcast %2 : vector<8x1xf32> to vector<8x128xf32>
    %5 = vector.broadcast %3 : vector<1x128xf32> to vector<8x128xf32>
    %6 = arith.mulf %4, %5 : vector<8x128xf32>
    %c0_5 = arith.constant 0 : index
    %c0_6 = arith.constant 0 : index
    %7 = vector.load %arg3[%c0_5, %c0_6] : memref<1x128xf32, #tpu.memory_space<vmem>>, vector<1x128xf32>
    %8 = vector.broadcast %7 : vector<1x128xf32> to vector<8x128xf32>
    %9 = arith.addf %6, %8 : vector<8x128xf32>
    %10 = vector.extract_strided_slice %9 {offsets = [0, 0], sizes = [1, 128], strides = [1, 1]} : vector<8x128xf32> to vector<1x128xf32>
    %cst_7 = arith.constant dense<0.000000e+00> : vector<1x128xf32>
    %11 = tpu.matmul %1, %0, %cst_7 {dimension_numbers = #tpu.dot_dimension_numbers<[1], [0], [0], [1], [0, 0, 1, 1], [], []>} : vector<1x128xf32>, vector<128x128xf32>, vector<1x128xf32> -> vector<1x128xf32>
    %12 = arith.addf %10, %11 : vector<1x128xf32>
    %13 = math.tanh %12 : vector<1x128xf32>
    %c0_8 = arith.constant 0 : index
    %c0_9 = arith.constant 0 : index
    %14 = vector.load %arg8[%c0_8, %c0_9] : memref<8x128xf32, #tpu.memory_space<vmem>>, vector<1x128xf32>
    tpu.vector_store %arg8[%c0_8, %c0_9], %13 {strides = array<i32>} : memref<8x128xf32, #tpu.memory_space<vmem>>, vector<1x128xf32>,
    %15 = vector.extract_strided_slice %9 {offsets = [1, 0], sizes = [1, 128], strides = [1, 1]} : vector<8x128xf32> to vector<1x128xf32>
    %cst_10 = arith.constant dense<0.000000e+00> : vector<1x128xf32>
    %16 = tpu.matmul %13, %0, %cst_10 {dimension_numbers = #tpu.dot_dimension_numbers<[1], [0], [0], [1], [0, 0, 1, 1], [], []>} : vector<1x128xf32>, vector<128x128xf32>, vector<1x128xf32> -> vector<1x128xf32>
    %17 = arith.addf %15, %16 : vector<1x128xf32>
    %18 = math.tanh %17 : vector<1x128xf32>
    %c1 = arith.constant 1 : index
    %c0_11 = arith.constant 0 : index
    %19 = vector.load %arg8[%c1, %c0_11] : memref<8x128xf32, #tpu.memory_space<vmem>>, vector<1x128xf32>
    tpu.vector_store %arg8[%c1, %c0_11], %18 {strides = array<i32>} : memref<8x128xf32, #tpu.memory_space<vmem>>, vector<1x128xf32>,
    %20 = vector.extract_strided_slice %9 {offsets = [2, 0], sizes = [1, 128], strides = [1, 1]} : vector<8x128xf32> to vector<1x128xf32>
    %cst_12 = arith.constant dense<0.000000e+00> : vector<1x128xf32>
    %21 = tpu.matmul %18, %0, %cst_12 {dimension_numbers = #tpu.dot_dimension_numbers<[1], [0], [0], [1], [0, 0, 1, 1], [], []>} : vector<1x128xf32>, vector<128x128xf32>, vector<1x128xf32> -> vector<1x128xf32>
    %22 = arith.addf %20, %21 : vector<1x128xf32>
    %23 = math.tanh %22 : vector<1x128xf32>
    %c2 = arith.constant 2 : index
    %c0_13 = arith.constant 0 : index
    %24 = vector.load %arg8[%c2, %c0_13] : memref<8x128xf32, #tpu.memory_space<vmem>>, vector<1x128xf32>
    tpu.vector_store %arg8[%c2, %c0_13], %23 {strides = array<i32>} : memref<8x128xf32, #tpu.memory_space<vmem>>, vector<1x128xf32>,
    %25 = vector.extract_strided_slice %9 {offsets = [3, 0], sizes = [1, 128], strides = [1, 1]} : vector<8x128xf32> to vector<1x128xf32>
    %cst_14 = arith.constant dense<0.000000e+00> : vector<1x128xf32>
    %26 = tpu.matmul %23, %0, %cst_14 {dimension_numbers = #tpu.dot_dimension_numbers<[1], [0], [0], [1], [0, 0, 1, 1], [], []>} : vector<1x128xf32>, vector<128x128xf32>, vector<1x128xf32> -> vector<1x128xf32>
    %27 = arith.addf %25, %26 : vector<1x128xf32>
    %28 = math.tanh %27 : vector<1x128xf32>
    %c3 = arith.constant 3 : index
    %c0_15 = arith.constant 0 : index
    %29 = vector.load %arg8[%c3, %c0_15] : memref<8x128xf32, #tpu.memory_space<vmem>>, vector<1x128xf32>
    tpu.vector_store %arg8[%c3, %c0_15], %28 {strides = array<i32>} : memref<8x128xf32, #tpu.memory_space<vmem>>, vector<1x128xf32>,
    %30 = vector.extract_strided_slice %9 {offsets = [4, 0], sizes = [1, 128], strides = [1, 1]} : vector<8x128xf32> to vector<1x128xf32>
    %cst_16 = arith.constant dense<0.000000e+00> : vector<1x128xf32>
    %31 = tpu.matmul %28, %0, %cst_16 {dimension_numbers = #tpu.dot_dimension_numbers<[1], [0], [0], [1], [0, 0, 1, 1], [], []>} : vector<1x128xf32>, vector<128x128xf32>, vector<1x128xf32> -> vector<1x128xf32>
    %32 = arith.addf %30, %31 : vector<1x128xf32>
    %33 = math.tanh %32 : vector<1x128xf32>
    %c4 = arith.constant 4 : index
    %c0_17 = arith.constant 0 : index
    %34 = vector.load %arg8[%c4, %c0_17] : memref<8x128xf32, #tpu.memory_space<vmem>>, vector<1x128xf32>
    tpu.vector_store %arg8[%c4, %c0_17], %33 {strides = array<i32>} : memref<8x128xf32, #tpu.memory_space<vmem>>, vector<1x128xf32>,
    %35 = vector.extract_strided_slice %9 {offsets = [5, 0], sizes = [1, 128], strides = [1, 1]} : vector<8x128xf32> to vector<1x128xf32>
    %cst_18 = arith.constant dense<0.000000e+00> : vector<1x128xf32>
    %36 = tpu.matmul %33, %0, %cst_18 {dimension_numbers = #tpu.dot_dimension_numbers<[1], [0], [0], [1], [0, 0, 1, 1], [], []>} : vector<1x128xf32>, vector<128x128xf32>, vector<1x128xf32> -> vector<1x128xf32>
    %37 = arith.addf %35, %36 : vector<1x128xf32>
    %38 = math.tanh %37 : vector<1x128xf32>
    %c5 = arith.constant 5 : index
    %c0_19 = arith.constant 0 : index
    %39 = vector.load %arg8[%c5, %c0_19] : memref<8x128xf32, #tpu.memory_space<vmem>>, vector<1x128xf32>
    tpu.vector_store %arg8[%c5, %c0_19], %38 {strides = array<i32>} : memref<8x128xf32, #tpu.memory_space<vmem>>, vector<1x128xf32>,
    %40 = vector.extract_strided_slice %9 {offsets = [6, 0], sizes = [1, 128], strides = [1, 1]} : vector<8x128xf32> to vector<1x128xf32>
    %cst_20 = arith.constant dense<0.000000e+00> : vector<1x128xf32>
    %41 = tpu.matmul %38, %0, %cst_20 {dimension_numbers = #tpu.dot_dimension_numbers<[1], [0], [0], [1], [0, 0, 1, 1], [], []>} : vector<1x128xf32>, vector<128x128xf32>, vector<1x128xf32> -> vector<1x128xf32>
    %42 = arith.addf %40, %41 : vector<1x128xf32>
    %43 = math.tanh %42 : vector<1x128xf32>
    %c6 = arith.constant 6 : index
    %c0_21 = arith.constant 0 : index
    %44 = vector.load %arg8[%c6, %c0_21] : memref<8x128xf32, #tpu.memory_space<vmem>>, vector<1x128xf32>
    tpu.vector_store %arg8[%c6, %c0_21], %43 {strides = array<i32>} : memref<8x128xf32, #tpu.memory_space<vmem>>, vector<1x128xf32>,
    %45 = vector.extract_strided_slice %9 {offsets = [7, 0], sizes = [1, 128], strides = [1, 1]} : vector<8x128xf32> to vector<1x128xf32>
    %cst_22 = arith.constant dense<0.000000e+00> : vector<1x128xf32>
    %46 = tpu.matmul %43, %0, %cst_22 {dimension_numbers = #tpu.dot_dimension_numbers<[1], [0], [0], [1], [0, 0, 1, 1], [], []>} : vector<1x128xf32>, vector<128x128xf32>, vector<1x128xf32> -> vector<1x128xf32>
    %47 = arith.addf %45, %46 : vector<1x128xf32>
    %48 = math.tanh %47 : vector<1x128xf32>
    %c7 = arith.constant 7 : index
    %c0_23 = arith.constant 0 : index
    %49 = vector.load %arg8[%c7, %c0_23] : memref<8x128xf32, #tpu.memory_space<vmem>>, vector<1x128xf32>
    tpu.vector_store %arg8[%c7, %c0_23], %48 {strides = array<i32>} : memref<8x128xf32, #tpu.memory_space<vmem>>, vector<1x128xf32>,
    %c0_24 = arith.constant 0 : index
    %c0_25 = arith.constant 0 : index
    %50 = vector.load %arg7[%c0_24, %c0_25] : memref<1x128xf32, #tpu.memory_space<vmem>>, vector<1x128xf32>
    tpu.vector_store %arg7[%c0_24, %c0_25], %48 {strides = array<i32>} : memref<1x128xf32, #tpu.memory_space<vmem>>, vector<1x128xf32>,
    %c0_26 = arith.constant 0 : index
    %c0_27 = arith.constant 0 : index
    %51 = vector.load %arg8[%c0_26, %c0_27] : memref<8x128xf32, #tpu.memory_space<vmem>>, vector<8x128xf32>
    %c0_28 = arith.constant 0 : index
    %c0_29 = arith.constant 0 : index
    %52 = vector.load %arg4[%c0_28, %c0_29] : memref<1x128xf32, #tpu.memory_space<vmem>>, vector<1x128xf32>
    %53 = vector.broadcast %52 : vector<1x128xf32> to vector<8x128xf32>
    %54 = arith.mulf %51, %53 : vector<8x128xf32>
    %cst_30 = arith.constant dense<0.000000e+00> : vector<8xf32>
    %55 = vector.multi_reduction <add>, %54, %cst_30 [1] : vector<8x128xf32> to vector<8xf32>
    %56 = vector.shape_cast %55 : vector<8xf32> to vector<8x1xf32>
    %c0_31 = arith.constant 0 : index
    %c0_32 = arith.constant 0 : index
    %57 = memref.load %arg5[%c0_31, %c0_32] : memref<1x1xf32, #tpu.memory_space<smem>>
    %58 = vector.broadcast %57 : f32 to vector<8x1xf32>
    %59 = arith.addf %56, %58 : vector<8x1xf32>
    %c0_33 = arith.constant 0 : index
    %c0_34 = arith.constant 0 : index
    %60 = vector.load %arg6[%c0_33, %c0_34] : memref<8x1xf32, #tpu.memory_space<vmem>>, vector<8x1xf32>
    tpu.vector_store %arg6[%c0_33, %c0_34], %59 {strides = array<i32>} : memref<8x1xf32, #tpu.memory_space<vmem>>, vector<8x1xf32>,
    return
  }
}

</mosaic_0001>

<bundles_post_ra>
// kernel: tpu_custom_call.1
= control target key start
LH: loop header
LB: loop body
LE: loop exit
PB: predicated region body
PF: predicated region fallthrough
CT: control target
= control target key end

     0   :  { %14 = vsyncpa [#allocation6], 0  ;;  %s1611_s0 = inlined_call_operand.vmem [shape: f32[8,1], index: 0, kind: input, shape index: {}]   ;;  %s1612_s1 = inlined_call_operand.vmem [shape: f32[1,128], index: 1, kind: input, shape index: {}]   ;;  %s1613_s2 = inlined_call_operand.hbm [shape: f32[128,128], index: 2, kind: input, shape index: {}]   ;;  %s1614_s3 = inlined_call_operand.vmem [shape: f32[1,128], index: 3, kind: input, shape index: {}]   ;;  %s1615_s4 = inlined_call_operand.vmem [shape: f32[1,128], index: 4, kind: input, shape index: {}]   ;;  %s1616_s5 = inlined_call_operand.<no memory space> [shape: f32[1,1], index: 5, kind: input, shape index: {}]   ;;  %s1617_s6 = inlined_call_operand.vmem [shape: f32[8,1], index: 6, kind: output, shape index: {0}]   ;;  %s1618_s7 = inlined_call_operand.hbm [shape: f32[1,128], index: 7, kind: output, shape index: {1}]  }
   0x1   :  { %15 = vsyncpa [#allocation7], 0  ;;  %s1225_s24 = smov [#allocation5]  }
   0x2   :  { %s25_s25 = sshll.u32 %s1225_s24, 4  ;;  %s26_s25 = int_to_ptr.vmem [resolvable:$true] %s25_s25 }
   0x3   :  { %s1189_s26 = scalar_lea.vmem %s26_s25, 2048  ;;  %p1194_p1 = scmp.lt.s32.totalorder %s26_s25, %s26_s25 }
   0x4   :  { %p1190_p0 = scmp.ne.s32.totalorder %s26_s25, %s1189_s26  ;;  %p1195_p2 = scmp.lt.s32.totalorder %s1189_s26, %s1189_s26 }
   0x6   :  { %p1196_p3 = por %p1195_p2, %p1194_p1 }
   0x8   :  { %p1197_p4 = pnand %p1196_p3, %p1190_p0 }
   0xa   :  { %1200 = shalt.err (!%p1197_p4)
}
   0xb   :  { %s1226_s27 = smov 128   ;;  %s1227_s28 = smov 8  }
   0xc   :  { %31 = dma.hbm_to_vmem [thread:$0]  %s1613_s2, 2048, %s26_s25, [#allocation6], %s1226_s27, %s1226_s27, %s1227_s28  }
   0xd   :  { %1221 = dma.done.wait [#allocation6], 2048  }
   0xe   :  { %1222 = vsyncadd [#allocation6], 4294965248  ;;  %v1228_v0 = vmov 0.0   ;;  %vm1229_vm0 = vmmov 0   ;;  %v1230_v1 = vmov 0   ;;  %v1281_v2 = vld [vmem:[#allocation5 + $0x78] sm:$0xff] }
   0xf   :  { %877 = vmatprep.subr.mxu0 %v1228_v0  ;;  %909 = vmatprep.mubr.msk.f32.mxu0 %vm1229_vm0, %v1228_v0  ;;  %v1283_v3 = vld [vmem:[#allocation5 + $0x70] sm:$0xff]  ;;  %v1288_v4 = vld [vmem:[#allocation5 + $0x68] sm:$0xff]  ;;  %v1294_v5 = vld [vmem:[#allocation5 + $0x60] sm:$0xff]  ;;  %s1231_s12 = smov [#allocation8]  }
  0x10   :  { %1164 = vset.pattern.permute.xlu0 %v1230_v1  ;;  %912 = vmatprep.subr.mxu1 %v1228_v0  ;;  %v57_v6 = vld [vmem:[%s1611_s0] sm:$0xff]  ;;  %v1308_v8 = vld [vmem:[#allocation5 + $0x50] sm:$0xff]  ;;  %v1314_v9 = vld [vmem:[#allocation5 + $0x48] sm:$0xff]  ;;  %s727_s13 = sshll.u32 %s1231_s12, 4  ;;  %s728_s13 = int_to_ptr.vmem [resolvable:$true] %s727_s13 }
  0x11   :  { %944 = vmatprep.mubr.msk.f32.mxu1 %vm1229_vm0, %v1228_v0  ;;  %878 = vmatpush3.msra.mxu0 %v1281_v2  ;;  %v1303_v7 = vld [vmem:[#allocation5 + $0x58] sm:$0xff]  ;;  %v1320_v10 = vld [vmem:[#allocation5 + $0x40] sm:$0xff]  ;;  %v1332_v12 = vld [vmem:[#allocation5 + $0x30] sm:$0xff]  ;;  %s1201_s14 = scalar_lea.vmem %s728_s13, 16  ;;  %s1205_s15 = scalar_lea.vmem %s728_s13, 32 }
  0x12   :  { %913 = vmatpush3.msra.mxu1 %v1281_v2  ;;  %879 = vmatprep.subr.mxu0 %v1228_v0  ;;  %v1326_v11 = vld [vmem:[#allocation5 + $0x38] sm:$0xff]  ;;  %v1338_v13 = vld [vmem:[#allocation5 + $0x28] sm:$0xff]  ;;  %v1344_v14 = vld [vmem:[#allocation5 + $0x20] sm:$0xff]  ;;  %p1202_p5 = scmp.ne.s32.totalorder %s728_s13, %s1201_s14  ;;  %p1206_p6 = scmp.lt.s32.totalorder %s728_s13, %s728_s13 }
  0x13   :  { %914 = vmatprep.subr.mxu1 %v1228_v0  ;;  %880 = vmatpush3.msra.mxu0 %v1283_v3  ;;  %v1350_v15 = vld [vmem:[#allocation5 + $0x18] sm:$0xff]  ;;  %v1356_v16 = vld [vmem:[#allocation5 + $0x10] sm:$0xff]  ;;  %v1362_v17 = vld [vmem:[#allocation5 + $0x8] sm:$0xff]  ;;  %p1207_p7 = scmp.lt.s32.totalorder %s1205_s15, %s1201_s14 }
  0x14   :  { %915 = vmatpush3.msra.mxu1 %v1283_v3  ;;  %881 = vmatprep.subr.mxu0 %v1228_v0  ;;  %v1368_v18 = vld [vmem:[#allocation5] sm:$0xff]  ;;  %v738_v19 = vld [vmem:[%s1612_s1] ss:$0 sm:$0xff] }
  0x15   :  { %916 = vmatprep.subr.mxu1 %v1228_v0  ;;  %882 = vmatpush3.msra.mxu0 %v1288_v4  ;;  %v739_v22 = vld [vmem:[%s1614_s3] ss:$0 sm:$0xff]  ;;  %p1208_p8 = por %p1207_p7, %p1206_p6 }
  0x16   :  { %917 = vmatpush3.msra.mxu1 %v1288_v4  ;;  %883 = vmatprep.subr.mxu0 %v1228_v0 }
  0x17   :  { %61 = vperm.xlu0 %1164, %v57_v6   ;;  %884 = vmatpush3.msra.mxu0 %v1294_v5  ;;  %p1209_p9 = pnand %p1208_p8, %p1202_p5 }
  0x18   :  { %918 = vmatprep.subr.mxu1 %v1228_v0  ;;  %885 = vmatprep.subr.mxu0 %v1228_v0 }
  0x19   :  { %919 = vmatpush3.msra.mxu1 %v1294_v5  ;;  %886 = vmatpush3.msra.mxu0 %v1303_v7 }
  0x1a   :  { %920 = vmatprep.subr.mxu1 %v1228_v0  ;;  %887 = vmatprep.subr.mxu0 %v1228_v0 }
  0x1b   :  { %921 = vmatpush3.msra.mxu1 %v1303_v7  ;;  %888 = vmatpush3.msra.mxu0 %v1308_v8 }
  0x1c   :  { %922 = vmatprep.subr.mxu1 %v1228_v0  ;;  %889 = vmatprep.subr.mxu0 %v1228_v0 }
  0x1d   :  { %923 = vmatpush3.msra.mxu1 %v1308_v8  ;;  %890 = vmatpush3.msra.mxu0 %v1314_v9 }
  0x1e   :  { %924 = vmatprep.subr.mxu1 %v1228_v0  ;;  %891 = vmatprep.subr.mxu0 %v1228_v0 }
  0x1f   :  { %925 = vmatpush3.msra.mxu1 %v1314_v9  ;;  %892 = vmatpush3.msra.mxu0 %v1320_v10 }
  0x20   :  { %926 = vmatprep.subr.mxu1 %v1228_v0  ;;  %893 = vmatprep.subr.mxu0 %v1228_v0 }
  0x21   :  { %927 = vmatpush3.msra.mxu1 %v1320_v10  ;;  %894 = vmatpush3.msra.mxu0 %v1326_v11 }
  0x22   :  { %928 = vmatprep.subr.mxu1 %v1228_v0  ;;  %895 = vmatprep.subr.mxu0 %v1228_v0 }
  0x23   :  { %929 = vmatpush3.msra.mxu1 %v1326_v11  ;;  %896 = vmatpush3.msra.mxu0 %v1332_v12 }
  0x24   :  { %930 = vmatprep.subr.mxu1 %v1228_v0  ;;  %897 = vmatprep.subr.mxu0 %v1228_v0 }
  0x25   :  { %931 = vmatpush3.msra.mxu1 %v1332_v12  ;;  %898 = vmatpush3.msra.mxu0 %v1338_v13 }
  0x26   :  { %932 = vmatprep.subr.mxu1 %v1228_v0  ;;  %899 = vmatprep.subr.mxu0 %v1228_v0 }
  0x27   :  { %933 = vmatpush3.msra.mxu1 %v1338_v13  ;;  %900 = vmatpush3.msra.mxu0 %v1344_v14 }
  0x28   :  { %934 = vmatprep.subr.mxu1 %v1228_v0  ;;  %901 = vmatprep.subr.mxu0 %v1228_v0 }
  0x29   :  { %935 = vmatpush3.msra.mxu1 %v1344_v14  ;;  %902 = vmatpush3.msra.mxu0 %v1350_v15 }
  0x2a   :  { %936 = vmatprep.subr.mxu1 %v1228_v0  ;;  %903 = vmatprep.subr.mxu0 %v1228_v0 }
  0x2b   :  { %937 = vmatpush3.msra.mxu1 %v1350_v15  ;;  %904 = vmatpush3.msra.mxu0 %v1356_v16 }
  0x2c   :  { %938 = vmatprep.subr.mxu1 %v1228_v0  ;;  %905 = vmatprep.subr.mxu0 %v1228_v0 }
  0x2d   :  { %939 = vmatpush3.msra.mxu1 %v1356_v16  ;;  %906 = vmatpush3.msra.mxu0 %v1362_v17 }
  0x2e   :  { %940 = vmatprep.subr.mxu1 %v1228_v0  ;;  %907 = vmatprep.subr.mxu0 %v1228_v0 }
  0x2f   :  { %941 = vmatpush3.msra.mxu1 %v1362_v17  ;;  %908 = vmatpush3.msra.mxu0 %v1368_v18 }
  0x30   :  { %942 = vmatprep.subr.mxu1 %v1228_v0  ;;  %910 = vmatmul.mubr.f32.vlgmr.msra.gmra.mxu0 %v1228_v0 }
  0x31   :  { %943 = vmatpush3.msra.mxu1 %v1368_v18  ;;  %947 = vmatprep.subr.mxu0 %v1228_v0 }
  0x32   :  { %979 = vmatprep.mubr.msk.f32.mxu0 %vm1229_vm0, %v1228_v0  ;;  %948 = vmatpush3.msra.mxu0 %v1281_v2 }
  0x33   :  { %982 = vmatprep.subr.mxu1 %v1228_v0  ;;  %949 = vmatprep.subr.mxu0 %v1228_v0 }
  0x34   :  { %950 = vmatpush3.msra.mxu0 %v1283_v3 }
  0x35   :  { %951 = vmatprep.subr.mxu0 %v1228_v0 }
  0x36   :  { %952 = vmatpush3.msra.mxu0 %v1288_v4 }
  0x37   :  { %953 = vmatprep.subr.mxu0 %v1228_v0 }
  0x38   :  { %954 = vmatpush3.msra.mxu0 %v1294_v5 }
  0x39   :  { %955 = vmatprep.subr.mxu0 %v1228_v0 }
  0x3a   :  { %956 = vmatpush3.msra.mxu0 %v1303_v7 }
  0x3b   :  { %957 = vmatprep.subr.mxu0 %v1228_v0 }
  0x3c   :  { %958 = vmatpush3.msra.mxu0 %v1308_v8 }
  0x3d   :  { %959 = vmatprep.subr.mxu0 %v1228_v0 }
  0x3e   :  { %960 = vmatpush3.msra.mxu0 %v1314_v9 }
  0x3f   :  { %961 = vmatprep.subr.mxu0 %v1228_v0 }
  0x40   :  { %962 = vmatpush3.msra.mxu0 %v1320_v10 }
  0x41   :  { %963 = vmatprep.subr.mxu0 %v1228_v0 }
  0x42   :  { %964 = vmatpush3.msra.mxu0 %v1326_v11 }
  0x43   :  { %965 = vmatprep.subr.mxu0 %v1228_v0 }
  0x44   :  { %966 = vmatpush3.msra.mxu0 %v1332_v12 }
  0x45   :  { %967 = vmatprep.subr.mxu0 %v1228_v0 }
  0x46   :  { %968 = vmatpush3.msra.mxu0 %v1338_v13 }
  0x47   :  { %969 = vmatprep.subr.mxu0 %v1228_v0 }
  0x48   :  { %970 = vmatpush3.msra.mxu0 %v1344_v14 }
  0x49   :  { %971 = vmatprep.subr.mxu0 %v1228_v0 }
  0x4a   :  { %972 = vmatpush3.msra.mxu0 %v1350_v15 }
  0x4b   :  { %973 = vmatprep.subr.mxu0 %v1228_v0 }
  0x4c   :  { %974 = vmatpush3.msra.mxu0 %v1356_v16 }
  0x4d   :  { %975 = vmatprep.subr.mxu0 %v1228_v0 }
  0x4e   :  { %976 = vmatpush3.msra.mxu0 %v1362_v17 }
  0x4f   :  { %977 = vmatprep.subr.mxu0 %v1228_v0 }
  0x50   :  { %978 = vmatpush3.msra.mxu0 %v1368_v18 }
  0x51   :  { %1017 = vmatprep.subr.mxu0 %v1228_v0 }
  0x92   :  { %v62_v20 = vpop.permute.xlu0 %61 }
  0x93   :  { %v70_v21 = vmul.f32 %v738_v19, %v62_v20 }
  0x95   :  { %v1421_v23 = vadd.f32 %v739_v22, %v70_v21 }
  0xf0   :  { %v145_v24 = vpop.f32.mrf.mxu0 }
  0xf1   :  { %v149_v25 = vadd.f32 %v145_v24, %v1421_v23 }
  0xf2   :  { %v911_v26 = vpop.f32.mrf.mxu0 }
  0xf3   :  { %1165 = vtanh.f32 %v149_v25 }
 0x100   :  { %v1166_v27 = vpop.eup %1165 }
 0x101   :  { %151 = vst [vmem:[#allocation2] sm:$0x1] %v1166_v27  ;;  %945 = vmatmul.mubr.f32.vlgmr.msra.gmra.mxu1 %v1166_v27 }
 0x102   :  { %983 = vmatpush3.msra.mxu1 %v1281_v2  ;;  %1014 = vmatprep.mubr.msk.f32.mxu1 %vm1229_vm0, %v1228_v0 }
 0x103   :  { %984 = vmatprep.subr.mxu1 %v1228_v0 }
 0x104   :  { %985 = vmatpush3.msra.mxu1 %v1283_v3 }
 0x105   :  { %986 = vmatprep.subr.mxu1 %v1228_v0 }
 0x106   :  { %987 = vmatpush3.msra.mxu1 %v1288_v4 }
 0x107   :  { %988 = vmatprep.subr.mxu1 %v1228_v0 }
 0x108   :  { %989 = vmatpush3.msra.mxu1 %v1294_v5 }
 0x109   :  { %990 = vmatprep.subr.mxu1 %v1228_v0 }
 0x10a   :  { %991 = vmatpush3.msra.mxu1 %v1303_v7 }
 0x10b   :  { %992 = vmatprep.subr.mxu1 %v1228_v0 }
 0x10c   :  { %993 = vmatpush3.msra.mxu1 %v1308_v8 }
 0x10d   :  { %994 = vmatprep.subr.mxu1 %v1228_v0 }
 0x10e   :  { %995 = vmatpush3.msra.mxu1 %v1314_v9 }
 0x10f   :  { %996 = vmatprep.subr.mxu1 %v1228_v0 }
 0x110   :  { %997 = vmatpush3.msra.mxu1 %v1320_v10 }
 0x111   :  { %998 = vmatprep.subr.mxu1 %v1228_v0 }
 0x112   :  { %999 = vmatpush3.msra.mxu1 %v1326_v11 }
 0x113   :  { %1000 = vmatprep.subr.mxu1 %v1228_v0 }
 0x114   :  { %1001 = vmatpush3.msra.mxu1 %v1332_v12 }
 0x115   :  { %1002 = vmatprep.subr.mxu1 %v1228_v0 }
 0x116   :  { %1003 = vmatpush3.msra.mxu1 %v1338_v13 }
 0x117   :  { %1004 = vmatprep.subr.mxu1 %v1228_v0 }
 0x118   :  { %1005 = vmatpush3.msra.mxu1 %v1344_v14 }
 0x119   :  { %1006 = vmatprep.subr.mxu1 %v1228_v0 }
 0x11a   :  { %1007 = vmatpush3.msra.mxu1 %v1350_v15 }
 0x11b   :  { %1008 = vmatprep.subr.mxu1 %v1228_v0 }
 0x11c   :  { %1009 = vmatpush3.msra.mxu1 %v1356_v16 }
 0x11d   :  { %1010 = vmatprep.subr.mxu1 %v1228_v0 }
 0x11e   :  { %1011 = vmatpush3.msra.mxu1 %v1362_v17 }
 0x11f   :  { %1012 = vmatprep.subr.mxu1 %v1228_v0 }
 0x120   :  { %1013 = vmatpush3.msra.mxu1 %v1368_v18 }
 0x121   :  { %1052 = vmatprep.subr.mxu1 %v1228_v0 }
 0x1c1   :  { %v218_v28 = vpop.f32.mrf.mxu1 }
 0x1c2   :  { %v223_v29 = vrot.slane %v218_v28, 7 }
 0x1c3   :  { %v946_v30 = vpop.f32.mrf.mxu1 }
 0x1c4   :  { %v225_v31 = vadd.f32 %v223_v29, %v1421_v23 }
 0x1c6   :  { %1167 = vtanh.f32 %v225_v31 }
 0x1d3   :  { %v1168_v32 = vpop.eup %1167 }
 0x1d4   :  { %227 = vst [vmem:[#allocation2] sm:$0x2] %v1168_v32  ;;  %v229_v33 = vrot.slane %v1168_v32, 1 }
 0x1d6   :  { %980 = vmatmul.mubr.f32.vlgmr.msra.gmra.mxu0 %v229_v33 }
 0x1d7   :  { %1018 = vmatpush3.msra.mxu0 %v1281_v2  ;;  %1049 = vmatprep.mubr.msk.f32.mxu0 %vm1229_vm0, %v1228_v0 }
 0x1d8   :  { %1019 = vmatprep.subr.mxu0 %v1228_v0 }
 0x1d9   :  { %1020 = vmatpush3.msra.mxu0 %v1283_v3 }
 0x1da   :  { %1021 = vmatprep.subr.mxu0 %v1228_v0 }
 0x1db   :  { %1022 = vmatpush3.msra.mxu0 %v1288_v4 }
 0x1dc   :  { %1023 = vmatprep.subr.mxu0 %v1228_v0 }
 0x1dd   :  { %1024 = vmatpush3.msra.mxu0 %v1294_v5 }
 0x1de   :  { %1025 = vmatprep.subr.mxu0 %v1228_v0 }
 0x1df   :  { %1026 = vmatpush3.msra.mxu0 %v1303_v7 }
 0x1e0   :  { %1027 = vmatprep.subr.mxu0 %v1228_v0 }
 0x1e1   :  { %1028 = vmatpush3.msra.mxu0 %v1308_v8 }
 0x1e2   :  { %1029 = vmatprep.subr.mxu0 %v1228_v0 }
 0x1e3   :  { %1030 = vmatpush3.msra.mxu0 %v1314_v9 }
 0x1e4   :  { %1031 = vmatprep.subr.mxu0 %v1228_v0 }
 0x1e5   :  { %1032 = vmatpush3.msra.mxu0 %v1320_v10 }
 0x1e6   :  { %1033 = vmatprep.subr.mxu0 %v1228_v0 }
 0x1e7   :  { %1034 = vmatpush3.msra.mxu0 %v1326_v11 }
 0x1e8   :  { %1035 = vmatprep.subr.mxu0 %v1228_v0 }
 0x1e9   :  { %1036 = vmatpush3.msra.mxu0 %v1332_v12 }
 0x1ea   :  { %1037 = vmatprep.subr.mxu0 %v1228_v0 }
 0x1eb   :  { %1038 = vmatpush3.msra.mxu0 %v1338_v13 }
 0x1ec   :  { %1039 = vmatprep.subr.mxu0 %v1228_v0 }
 0x1ed   :  { %1040 = vmatpush3.msra.mxu0 %v1344_v14 }
 0x1ee   :  { %1041 = vmatprep.subr.mxu0 %v1228_v0 }
 0x1ef   :  { %1042 = vmatpush3.msra.mxu0 %v1350_v15 }
 0x1f0   :  { %1043 = vmatprep.subr.mxu0 %v1228_v0 }
 0x1f1   :  { %1044 = vmatpush3.msra.mxu0 %v1356_v16 }
 0x1f2   :  { %1045 = vmatprep.subr.mxu0 %v1228_v0 }
 0x1f3   :  { %1046 = vmatpush3.msra.mxu0 %v1362_v17 }
 0x1f4   :  { %1047 = vmatprep.subr.mxu0 %v1228_v0 }
 0x1f5   :  { %1048 = vmatpush3.msra.mxu0 %v1368_v18 }
 0x1f6   :  { %1087 = vmatprep.subr.mxu0 %v1228_v0 }
 0x296   :  { %v297_v34 = vpop.f32.mrf.mxu0 }
 0x297   :  { %v302_v35 = vrot.slane %v297_v34, 6 }
 0x298   :  { %v981_v36 = vpop.f32.mrf.mxu0 }
 0x299   :  { %v304_v37 = vadd.f32 %v302_v35, %v1421_v23 }
 0x29b   :  { %1169 = vtanh.f32 %v304_v37 }
 0x2a8   :  { %v1170_v38 = vpop.eup %1169 }
 0x2a9   :  { %306 = vst [vmem:[#allocation2] sm:$0x4] %v1170_v38  ;;  %v308_v39 = vrot.slane %v1170_v38, 2 }
 0x2ab   :  { %1015 = vmatmul.mubr.f32.vlgmr.msra.gmra.mxu1 %v308_v39 }
 0x2ac   :  { %1053 = vmatpush3.msra.mxu1 %v1281_v2  ;;  %1084 = vmatprep.mubr.msk.f32.mxu1 %vm1229_vm0, %v1228_v0 }
 0x2ad   :  { %1054 = vmatprep.subr.mxu1 %v1228_v0 }
 0x2ae   :  { %1055 = vmatpush3.msra.mxu1 %v1283_v3 }
 0x2af   :  { %1056 = vmatprep.subr.mxu1 %v1228_v0 }
 0x2b0   :  { %1057 = vmatpush3.msra.mxu1 %v1288_v4 }
 0x2b1   :  { %1058 = vmatprep.subr.mxu1 %v1228_v0 }
 0x2b2   :  { %1059 = vmatpush3.msra.mxu1 %v1294_v5 }
 0x2b3   :  { %1060 = vmatprep.subr.mxu1 %v1228_v0 }
 0x2b4   :  { %1061 = vmatpush3.msra.mxu1 %v1303_v7 }
 0x2b5   :  { %1062 = vmatprep.subr.mxu1 %v1228_v0 }
 0x2b6   :  { %1063 = vmatpush3.msra.mxu1 %v1308_v8 }
 0x2b7   :  { %1064 = vmatprep.subr.mxu1 %v1228_v0 }
 0x2b8   :  { %1065 = vmatpush3.msra.mxu1 %v1314_v9 }
 0x2b9   :  { %1066 = vmatprep.subr.mxu1 %v1228_v0 }
 0x2ba   :  { %1067 = vmatpush3.msra.mxu1 %v1320_v10 }
 0x2bb   :  { %1068 = vmatprep.subr.mxu1 %v1228_v0 }
 0x2bc   :  { %1069 = vmatpush3.msra.mxu1 %v1326_v11 }
 0x2bd   :  { %1070 = vmatprep.subr.mxu1 %v1228_v0 }
 0x2be   :  { %1071 = vmatpush3.msra.mxu1 %v1332_v12 }
 0x2bf   :  { %1072 = vmatprep.subr.mxu1 %v1228_v0 }
 0x2c0   :  { %1073 = vmatpush3.msra.mxu1 %v1338_v13 }
 0x2c1   :  { %1074 = vmatprep.subr.mxu1 %v1228_v0 }
 0x2c2   :  { %1075 = vmatpush3.msra.mxu1 %v1344_v14 }
 0x2c3   :  { %1076 = vmatprep.subr.mxu1 %v1228_v0 }
 0x2c4   :  { %1077 = vmatpush3.msra.mxu1 %v1350_v15 }
 0x2c5   :  { %1078 = vmatprep.subr.mxu1 %v1228_v0 }
 0x2c6   :  { %1079 = vmatpush3.msra.mxu1 %v1356_v16 }
 0x2c7   :  { %1080 = vmatprep.subr.mxu1 %v1228_v0 }
 0x2c8   :  { %1081 = vmatpush3.msra.mxu1 %v1362_v17 }
 0x2c9   :  { %1082 = vmatprep.subr.mxu1 %v1228_v0 }
 0x2ca   :  { %1083 = vmatpush3.msra.mxu1 %v1368_v18 }
 0x2cb   :  { %1122 = vmatprep.subr.mxu1 %v1228_v0 }
 0x36b   :  { %v376_v40 = vpop.f32.mrf.mxu1 }
 0x36c   :  { %v381_v41 = vrot.slane %v376_v40, 5 }
 0x36d   :  { %v1016_v42 = vpop.f32.mrf.mxu1 }
 0x36e   :  { %v383_v43 = vadd.f32 %v381_v41, %v1421_v23 }
 0x370   :  { %1171 = vtanh.f32 %v383_v43 }
 0x37d   :  { %v1172_v44 = vpop.eup %1171 }
 0x37e   :  { %385 = vst [vmem:[#allocation2] sm:$0x8] %v1172_v44  ;;  %v387_v45 = vrot.slane %v1172_v44, 3 }
 0x380   :  { %1050 = vmatmul.mubr.f32.vlgmr.msra.gmra.mxu0 %v387_v45 }
 0x381   :  { %1088 = vmatpush3.msra.mxu0 %v1281_v2  ;;  %1119 = vmatprep.mubr.msk.f32.mxu0 %vm1229_vm0, %v1228_v0 }
 0x382   :  { %1089 = vmatprep.subr.mxu0 %v1228_v0 }
 0x383   :  { %1090 = vmatpush3.msra.mxu0 %v1283_v3 }
 0x384   :  { %1091 = vmatprep.subr.mxu0 %v1228_v0 }
 0x385   :  { %1092 = vmatpush3.msra.mxu0 %v1288_v4 }
 0x386   :  { %1093 = vmatprep.subr.mxu0 %v1228_v0 }
 0x387   :  { %1094 = vmatpush3.msra.mxu0 %v1294_v5 }
 0x388   :  { %1095 = vmatprep.subr.mxu0 %v1228_v0 }
 0x389   :  { %1096 = vmatpush3.msra.mxu0 %v1303_v7 }
 0x38a   :  { %1097 = vmatprep.subr.mxu0 %v1228_v0 }
 0x38b   :  { %1098 = vmatpush3.msra.mxu0 %v1308_v8 }
 0x38c   :  { %1099 = vmatprep.subr.mxu0 %v1228_v0 }
 0x38d   :  { %1100 = vmatpush3.msra.mxu0 %v1314_v9 }
 0x38e   :  { %1101 = vmatprep.subr.mxu0 %v1228_v0 }
 0x38f   :  { %1102 = vmatpush3.msra.mxu0 %v1320_v10 }
 0x390   :  { %1103 = vmatprep.subr.mxu0 %v1228_v0 }
 0x391   :  { %1104 = vmatpush3.msra.mxu0 %v1326_v11 }
 0x392   :  { %1105 = vmatprep.subr.mxu0 %v1228_v0 }
 0x393   :  { %1106 = vmatpush3.msra.mxu0 %v1332_v12 }
 0x394   :  { %1107 = vmatprep.subr.mxu0 %v1228_v0 }
 0x395   :  { %1108 = vmatpush3.msra.mxu0 %v1338_v13 }
 0x396   :  { %1109 = vmatprep.subr.mxu0 %v1228_v0 }
 0x397   :  { %1110 = vmatpush3.msra.mxu0 %v1344_v14 }
 0x398   :  { %1111 = vmatprep.subr.mxu0 %v1228_v0 }
 0x399   :  { %1112 = vmatpush3.msra.mxu0 %v1350_v15 }
 0x39a   :  { %1113 = vmatprep.subr.mxu0 %v1228_v0 }
 0x39b   :  { %1114 = vmatpush3.msra.mxu0 %v1356_v16 }
 0x39c   :  { %1115 = vmatprep.subr.mxu0 %v1228_v0 }
 0x39d   :  { %1116 = vmatpush3.msra.mxu0 %v1362_v17 }
 0x39e   :  { %1117 = vmatprep.subr.mxu0 %v1228_v0 }
 0x39f   :  { %1118 = vmatpush3.msra.mxu0 %v1368_v18 }
 0x440   :  { %v455_v46 = vpop.f32.mrf.mxu0 }
 0x441   :  { %v460_v47 = vrot.slane %v455_v46, 4 }
 0x442   :  { %v1051_v48 = vpop.f32.mrf.mxu0 }
 0x443   :  { %v462_v49 = vadd.f32 %v460_v47, %v1421_v23 }
 0x445   :  { %1173 = vtanh.f32 %v462_v49 }
 0x452   :  { %v1174_v50 = vpop.eup %1173 }
 0x453   :  { %464 = vst [vmem:[#allocation2] sm:$0x10] %v1174_v50  ;;  %v466_v51 = vrot.slane %v1174_v50, 4 }
 0x455   :  { %1085 = vmatmul.mubr.f32.vlgmr.msra.gmra.mxu1 %v466_v51 }
 0x456   :  { %1123 = vmatpush3.msra.mxu1 %v1281_v2  ;;  %1154 = vmatprep.mubr.msk.f32.mxu1 %vm1229_vm0, %v1228_v0 }
 0x457   :  { %1124 = vmatprep.subr.mxu1 %v1228_v0 }
 0x458   :  { %1125 = vmatpush3.msra.mxu1 %v1283_v3 }
 0x459   :  { %1126 = vmatprep.subr.mxu1 %v1228_v0 }
 0x45a   :  { %1127 = vmatpush3.msra.mxu1 %v1288_v4 }
 0x45b   :  { %1128 = vmatprep.subr.mxu1 %v1228_v0 }
 0x45c   :  { %1129 = vmatpush3.msra.mxu1 %v1294_v5  ;;  %v740_v5 = vld [vmem:[%s1615_s4] ss:$0 sm:$0xff] }
 0x45d   :  { %1130 = vmatprep.subr.mxu1 %v1228_v0 }
 0x45e   :  { %1131 = vmatpush3.msra.mxu1 %v1303_v7 }
 0x45f   :  { %1132 = vmatprep.subr.mxu1 %v1228_v0 }
 0x460   :  { %1133 = vmatpush3.msra.mxu1 %v1308_v8 }
 0x461   :  { %1134 = vmatprep.subr.mxu1 %v1228_v0 }
 0x462   :  { %1135 = vmatpush3.msra.mxu1 %v1314_v9 }
 0x463   :  { %1136 = vmatprep.subr.mxu1 %v1228_v0 }
 0x464   :  { %1137 = vmatpush3.msra.mxu1 %v1320_v10 }
 0x465   :  { %1138 = vmatprep.subr.mxu1 %v1228_v0 }
 0x466   :  { %1139 = vmatpush3.msra.mxu1 %v1326_v11 }
 0x467   :  { %1140 = vmatprep.subr.mxu1 %v1228_v0 }
 0x468   :  { %1141 = vmatpush3.msra.mxu1 %v1332_v12 }
 0x469   :  { %1142 = vmatprep.subr.mxu1 %v1228_v0 }
 0x46a   :  { %1143 = vmatpush3.msra.mxu1 %v1338_v13 }
 0x46b   :  { %1144 = vmatprep.subr.mxu1 %v1228_v0 }
 0x46c   :  { %1145 = vmatpush3.msra.mxu1 %v1344_v14 }
 0x46d   :  { %1146 = vmatprep.subr.mxu1 %v1228_v0 }
 0x46e   :  { %1147 = vmatpush3.msra.mxu1 %v1350_v15 }
 0x46f   :  { %1148 = vmatprep.subr.mxu1 %v1228_v0 }
 0x470   :  { %1149 = vmatpush3.msra.mxu1 %v1356_v16 }
 0x471   :  { %1150 = vmatprep.subr.mxu1 %v1228_v0 }
 0x472   :  { %1151 = vmatpush3.msra.mxu1 %v1362_v17 }
 0x473   :  { %1152 = vmatprep.subr.mxu1 %v1228_v0 }
 0x474   :  { %1153 = vmatpush3.msra.mxu1 %v1368_v18 }
 0x515   :  { %v534_v52 = vpop.f32.mrf.mxu1 }
 0x516   :  { %v539_v53 = vrot.slane %v534_v52, 3 }
 0x517   :  { %v1086_v54 = vpop.f32.mrf.mxu1 }
 0x518   :  { %v541_v55 = vadd.f32 %v539_v53, %v1421_v23 }
 0x51a   :  { %1175 = vtanh.f32 %v541_v55 }
 0x527   :  { %v1176_v56 = vpop.eup %1175 }
 0x528   :  { %543 = vst [vmem:[#allocation2] sm:$0x20] %v1176_v56  ;;  %v545_v57 = vrot.slane %v1176_v56, 5 }
 0x52a   :  { %1120 = vmatmul.mubr.f32.vlgmr.msra.gmra.mxu0 %v545_v57 }
 0x5ea   :  { %v613_v58 = vpop.f32.mrf.mxu0 }
 0x5eb   :  { %v618_v59 = vrot.slane %v613_v58, 2 }
 0x5ec   :  { %v1121_v60 = vpop.f32.mrf.mxu0 }
 0x5ed   :  { %v620_v61 = vadd.f32 %v618_v59, %v1421_v23 }
 0x5ef   :  { %1177 = vtanh.f32 %v620_v61 }
 0x5fc   :  { %v1178_v62 = vpop.eup %1177 }
 0x5fd   :  { %622 = vst [vmem:[#allocation2] sm:$0x40] %v1178_v62  ;;  %v624_v63 = vrot.slane %v1178_v62, 6 }
 0x5ff   :  { %1155 = vmatmul.mubr.f32.vlgmr.msra.gmra.mxu1 %v624_v63 }
 0x6bf   :  { %v692_v0 = vpop.f32.mrf.mxu1 }
 0x6c0   :  { %v697_v1 = vrot.slane %v692_v0, 1 }
 0x6c1   :  { %v1156_v2 = vpop.f32.mrf.mxu1 }
 0x6c2   :  { %v699_v3 = vadd.f32 %v697_v1, %v1421_v23 }
 0x6c4   :  { %1179 = vtanh.f32 %v699_v3 }
 0x6d1   :  { %v1180_v4 = vpop.eup %1179 }
 0x6d2   :  { %701 = vst [vmem:[#allocation2] sm:$0x80] %v1180_v4  ;;  %702 = vst [vmem:[#allocation8 - $0x7] sm:$0x80] %v1180_v4 }
 0x6d9   :  { %v703_v6 = vld [vmem:[#allocation2] sm:$0xff] }
 0x6da   :  { %v711_v7 = vmul.f32 %v740_v5, %v703_v6 }
 0x6dc   :  { %712 = vadd.xlane.f32.xlu0 %v711_v7 }
 0x6dd   :  { %1212 = shalt.err (!%p1209_p9)
}
 0x6de   :  { %730 = dma.vmem_to_hbm [thread:$0]  %s728_s13, 16, %s1618_s7, [#allocation7]   ;;  %v715_v8 = vstv %s1616_s5  ;;  %vm717_vm1 = vcmask 7168  }
 0x765   :  { %v713_v9 = vpop.xlane.xlu0 %712 }
 0x766   :  { %v716_v10 = vadd.f32 %v715_v8, %v713_v9 }
 0x768   :  { %718 = vst.msk [vmem:[%s1617_s6] sm:$0xff] %vm717_vm1, %v716_v10 }
 0x769   :  { %1223 = dma.done.wait [#allocation7], 16  }
 0x76a   :  { %1224 = vsyncadd [#allocation7], 4294967280 }
 0x76b   :  { %736 = vsyncpa [#allocation6], 1 }
 0x76c   :  { %737 = vsyncpa [#allocation7], 1 }

</bundles_post_ra>
